<compile_context>
chip_gen: v7x
topology: tpu7x:2x2x1
jax: 0.10.0
libtpu: 0.0.40
codegen_flags: <defaults>
</compile_context>

<pallas_src>
import functools

import jax
import jax.numpy as jnp
from jax import lax
from jax.experimental import pallas as pl
from jax.experimental.pallas import tpu as pltpu

NEG_SLOPE = 0.01  # nn.LeakyReLU(0.01)


def _round_up(x, m):
    return (x + m - 1) // m * m


def _choose_band_rows(n, h_out, w2, c_out, kp, in_itemsize):
    """Output rows per band.

    (a) hard cap: band input slab (Kp x ~br*w2) <= ~4 MiB so the double-buffered
        pipeline stays well inside the default scoped VMEM on v5e/v6e/v7x.
    (b) soft cap: the f32 accumulator (C_out x br*w2) stays around <=16 vregs.
    (c) soft target: >= ~8 total pipeline steps so DMA prologue/epilogue hide.
    """
    row_bytes = max(1, kp * w2 * in_itemsize)
    br_vmem = max(1, (4 << 20) // row_bytes)
    br_acc = max(1, (16 * 1024) // max(c_out, 1) // max(w2, 1))
    bands_wanted = -(-8 // max(n, 1))             # ceil(8 / n)
    br_steps = max(1, -(-h_out // bands_wanted))  # ceil(h_out / bands_wanted)
    return max(1, min(h_out, br_vmem, min(br_acc, br_steps)))


def _down_conv_kernel(x_ref, w_ref, o_ref, *, c_out, w2, svbp):
    """One (sample, band) step.

    x_ref: (1, Kp, BLENP)    space-to-depth band (incl. 1-row halo), flat spatial on lanes
    w_ref: (4*C_out, Kp)     per-shift weight slabs stacked along the M (sublane) axis
    o_ref: (1, C_out, SVBP)  lane-dense output slab for this band
    """
    x = x_ref[0]                       # (Kp, BLENP), compute dtype (bf16 by default)
    w = w_ref[...]                     # (4*C_out, Kp)

    # Single MXU push with M = 4*C_out (4x the old M-utilization); f32 accumulation.
    y = jnp.dot(w, x, preferred_element_type=jnp.float32)   # (4*C_out, BLENP)

    # Combine the four (dh, dw) shift groups with static shifted slices of the small
    # result slab; shifts are 0, 1, w2, w2+1 and svbp + w2 + 1 <= BLENP by construction.
    acc = (y[0 * c_out:1 * c_out, 0:svbp]
           + y[1 * c_out:2 * c_out, 1:1 + svbp]
           + y[2 * c_out:3 * c_out, w2:w2 + svbp]
           + y[3 * c_out:4 * c_out, w2 + 1:w2 + 1 + svbp])

    acc = jnp.where(acc > 0, acc, NEG_SLOPE * acc)           # LeakyReLU(0.01) in f32
    o_ref[0] = acc.astype(o_ref.dtype)


@functools.partial(jax.jit, static_argnames=("compute_dtype",))
def down_conv_forward(x, weight, *, compute_dtype=jnp.bfloat16):
    """DownConv forward (submodule=None): LeakyReLU(Conv2d(x, weight, k=4, s=2, p=1)).

    x:      (N, C_in, H, W)        float32 (NCHW, PyTorch layout)
    weight: (C_out, C_in, 4, 4)    float32 (PyTorch Conv2d OIHW layout)
    returns (N, C_out, H//2, W//2) in x.dtype
    Use compute_dtype=jnp.float32 for conv-exact results (bf16 is the perf default).
    """
    n, c_in, h, w = x.shape
    c_out = weight.shape[0]
    if weight.shape != (c_out, c_in, 4, 4):
        raise ValueError(f"expected weight (C_out, {c_in}, 4, 4), got {weight.shape}")
    if h % 2 or w % 2:
        raise ValueError("H and W must be even for stride-2 / pad-1 downsampling")

    h_out, w_out = h // 2, w // 2
    h2, w2 = h_out + 1, w_out + 1          # space-to-depth grid of the padded input
    s2 = h2 * w2                           # flat s2d spatial length per sample
    kd = 4 * c_in                          # contraction depth (all four (a,b) phases)
    in_itemsize = jnp.dtype(compute_dtype).itemsize
    packing = max(1, 4 // in_itemsize)     # rows packed per sublane for this dtype
    kp = _round_up(kd, 8 * packing)        # 8 (f32) / 16 (bf16) / 32 (int8) alignment

    # --- band sizing (spatial grid axis) ---
    br = _choose_band_rows(n, h_out, w2, c_out, kp, in_itemsize)
    nb = -(-h_out // br)                   # number of output-row bands
    svb = br * w2                          # valid flat output length per band
    svbp = _round_up(svb, 128)             # lane-dense output slab per band
    blen = svbp + w2 + 1                   # input lanes the largest shift can touch
    blenp = _round_up(blen, 128)
    # In-bounds guarantee for the kernel's static shifted slices (do not remove).
    assert blenp >= svbp + w2 + 1, (blenp, svbp, w2)

    # --- prepass: cast FIRST (halves prepass bytes), then pad + space-to-depth ---
    # xp[n, c, 2p+a, 2q+b] -> xf[n, (a*2+b)*C_in + c, p*w2 + q]
    xc = x.astype(compute_dtype)
    xp = jnp.pad(xc, ((0, 0), (0, 0), (1, 1), (1, 1)))
    xs = xp.reshape(n, c_in, h2, 2, w2, 2).transpose(0, 3, 5, 1, 2, 4)
    xf = xs.reshape(n, kd, s2)
    ext_cols = (nb - 1) * br * w2 + blenp          # >= s2 + 1 by construction
    xf = jnp.pad(xf, ((0, 0), (0, kp - kd), (0, ext_cols - s2)))

    # Banded view with a one-s2d-row halo per band (bands overlap by w2+1 lanes; the
    # duplication happens here in XLA so BlockSpec blocks stay non-overlapping).
    xb = jnp.stack(
        [xf[:, :, k * br * w2: k * br * w2 + blenp] for k in range(nb)], axis=1
    ).reshape(n * nb, kp, blenp)

    # --- weights: Wd[(dh*2+dw)*C_out + o, (a*2+b)*C_in + c] = W[o, c, 2dh+a, 2dw+b]
    wd = weight.reshape(c_out, c_in, 2, 2, 2, 2).transpose(2, 4, 0, 3, 5, 1)
    wd = wd.reshape(4, c_out, kd)
    wd = jnp.pad(wd, ((0, 0), (0, 0), (0, kp - kd)))
    wd = wd.reshape(4 * c_out, kp).astype(compute_dtype)

    kernel = functools.partial(_down_conv_kernel, c_out=c_out, w2=w2, svbp=svbp)

    out_itemsize = jnp.dtype(x.dtype).itemsize
    bytes_accessed = (n * nb * kp * blenp * in_itemsize
                      + 4 * c_out * kp * in_itemsize
                      + n * c_out * nb * svbp * out_itemsize)

    # Per-step VMEM need (double-buffered in/out + weights + f32 temporaries).  Only pin
    # vmem_limit_bytes when the default scoped limit (32 MiB) would be tight; 60 MiB cap
    # stays under v7x's 64 MiB physical VMEM.
    est_vmem = (2 * kp * blenp * in_itemsize
                + 2 * 4 * c_out * kp * in_itemsize
                + 2 * c_out * svbp * out_itemsize
                + (4 * c_out * blenp + c_out * svbp) * 4)
    vmem_limit = int(min(2 * est_vmem, 60 << 20)) if 2 * est_vmem > (30 << 20) else None

    out = pl.pallas_call(
        kernel,
        out_shape=jax.ShapeDtypeStruct((n, c_out, nb * svbp), x.dtype),
        grid_spec=pltpu.PrefetchScalarGridSpec(
            num_scalar_prefetch=0,
            grid=(n, nb),
            in_specs=[
                # banded input: leading axis is (sample, band) flattened
                pl.BlockSpec((1, kp, blenp), lambda i, k: (i * nb + k, 0, 0)),
                # resident weights (constant index_map).
                # TODO(synk): pipeline_mode=pl.Buffered(1) here would save one
                #             weight-sized VMEM buffer on v7x.
                pl.BlockSpec((4 * c_out, kp), lambda i, k: (0, 0)),
            ],
            out_specs=pl.BlockSpec((1, c_out, svbp), lambda i, k: (i, 0, k)),
        ),
        compiler_params=pltpu.CompilerParams(
            dimension_semantics=("parallel", "parallel"),
            vmem_limit_bytes=vmem_limit),
        cost_estimate=pl.CostEstimate(
            flops=2 * n * nb * (4 * c_out) * kp * blenp,
            transcendentals=0,
            bytes_accessed=bytes_accessed),
    )(xb, wd)

    # (N, C_out, nb*SVBP) -> drop lane padding per band, padded rows, garbage column.
    out = out.reshape(n, c_out, nb, svbp)[:, :, :, :svb]
    out = out.reshape(n, c_out, nb * br, w2)[:, :, :h_out, :w_out]
    return out


def _reference(x, weight, stride=2, pad=1):
    y = lax.conv_general_dilated(
        x, weight,
        window_strides=(stride, stride),
        padding=((pad, pad), (pad, pad)),
        dimension_numbers=("NCHW", "OIHW", "NCHW"),
    )
    return jnp.where(y > 0, y, NEG_SLOPE * y)


if __name__ == "__main__":
    key = jax.random.PRNGKey(0)
    kx, kw = jax.random.split(key)

    # Small shapes consistent with the module: N=2, C_in=4, C_out=8, H=W=16.
    N, C_IN, C_OUT, H, W, K = 2, 4, 8, 16, 16, 4

    x = jax.random.normal(kx, (N, C_IN, H, W), dtype=jnp.float32)
    fan_in = C_IN * K * K
    bound = 1.0 / (fan_in ** 0.5)
    weight = jax.random.uniform(
        kw, (C_OUT, C_IN, K, K), jnp.float32, -bound, bound)

    ref = _reference(x, weight)

    # f32 compute path: tight structural check.
    out_f32 = jax.block_until_ready(
        down_conv_forward(x, weight, compute_dtype=jnp.float32))
    assert out_f32.shape == (N, C_OUT, H // 2, W // 2), out_f32.shape
    assert jnp.allclose(out_f32, ref, atol=1e-3, rtol=1e-3), "f32 mismatch vs reference conv"

    # bf16 compute path (default perf config for v5e/v6e/v7x): loose tolerance vs f32 ref.
    out_bf16 = jax.block_until_ready(down_conv_forward(x, weight))
    assert out_bf16.shape == (N, C_OUT, H // 2, W // 2), out_bf16.shape
    assert jnp.allclose(out_bf16, ref, atol=3e-2, rtol=3e-2), "bf16 mismatch vs reference conv"

    print("KERNEL_OK")
</pallas_src>

<mosaic_0001>
module attributes {stable_mosaic.version = 11 : i64} {
  func.func @_down_conv_kernel(%arg0: i32, %arg1: i32, %arg2: memref<1x16x256xf32, #tpu.memory_space<vmem>>, %arg3: memref<32x16xf32, #tpu.memory_space<vmem>>, %arg4: memref<1x8x128xf32, #tpu.memory_space<vmem>>) attributes {dimension_semantics = [#tpu.dimension_semantics<parallel>, #tpu.dimension_semantics<parallel>], iteration_bounds = array<i64: 2, 4>, scalar_prefetch = 0 : i64, scratch_operands = 0 : i64, tpu.core_type = #tpu.core_type<tc>, window_params = [{transform_indices = @transform_0, window_bounds = array<i64: 1, 16, 256>}, {pipeline_mode = #tpu.pipeline_mode<synchronous>, transform_indices = @transform_1, window_bounds = array<i64: 32, 16>}, {transform_indices = @transform_2, window_bounds = array<i64: 1, 8, 128>}]} {
    %c0 = arith.constant 0 : index
    %c0_0 = arith.constant 0 : index
    %c0_1 = arith.constant 0 : index
    %0 = vector.load %arg2[%c0, %c0_0, %c0_1] : memref<1x16x256xf32, #tpu.memory_space<vmem>>, vector<1x16x256xf32>
    %1 = vector.shape_cast %0 : vector<1x16x256xf32> to vector<16x256xf32>
    %c0_2 = arith.constant 0 : index
    %c0_3 = arith.constant 0 : index
    %2 = vector.load %arg3[%c0_2, %c0_3] : memref<32x16xf32, #tpu.memory_space<vmem>>, vector<32x16xf32>
    %cst = arith.constant dense<0.000000e+00> : vector<32x256xf32>
    %3 = tpu.matmul %2, %1, %cst {dimension_numbers = #tpu.dot_dimension_numbers<[1], [0], [0], [1], [0, 0, 1, 1], [], []>} : vector<32x16xf32>, vector<16x256xf32>, vector<32x256xf32> -> vector<32x256xf32>
    %4 = vector.extract_strided_slice %3 {offsets = [0, 0], sizes = [8, 128], strides = [1, 1]} : vector<32x256xf32> to vector<8x128xf32>
    %5 = vector.extract_strided_slice %3 {offsets = [8, 1], sizes = [8, 128], strides = [1, 1]} : vector<32x256xf32> to vector<8x128xf32>
    %6 = arith.addf %4, %5 : vector<8x128xf32>
    %7 = vector.extract_strided_slice %3 {offsets = [16, 9], sizes = [8, 128], strides = [1, 1]} : vector<32x256xf32> to vector<8x128xf32>
    %8 = arith.addf %6, %7 : vector<8x128xf32>
    %9 = vector.extract_strided_slice %3 {offsets = [24, 10], sizes = [8, 128], strides = [1, 1]} : vector<32x256xf32> to vector<8x128xf32>
    %10 = arith.addf %8, %9 : vector<8x128xf32>
    %cst_4 = arith.constant 0.000000e+00 : f32
    %11 = vector.broadcast %cst_4 : f32 to vector<8x128xf32>
    %12 = arith.cmpf ogt, %10, %11 : vector<8x128xf32>
    %cst_5 = arith.constant 0.00999999977 : f32
    %13 = vector.broadcast %cst_5 : f32 to vector<8x128xf32>
    %14 = arith.mulf %13, %10 : vector<8x128xf32>
    %15 = arith.select %12, %10, %14 : vector<8x128xi1>, vector<8x128xf32>
    %c0_6 = arith.constant 0 : index
    %c0_7 = arith.constant 0 : index
    %c0_8 = arith.constant 0 : index
    %16 = vector.load %arg4[%c0_6, %c0_7, %c0_8] : memref<1x8x128xf32, #tpu.memory_space<vmem>>, vector<1x8x128xf32>
    %17 = vector.shape_cast %16 : vector<1x8x128xf32> to vector<8x128xf32>
    %18 = vector.shape_cast %15 : vector<8x128xf32> to vector<1x8x128xf32>
    tpu.vector_store %arg4[%c0_6, %c0_7, %c0_8], %18 {strides = array<i32>} : memref<1x8x128xf32, #tpu.memory_space<vmem>>, vector<1x8x128xf32>,
    return
  }
  func.func @transform_0(%arg0: i32, %arg1: i32) -> (i32, i32, i32) {
    %c4_i32 = arith.constant 4 : i32
    %0 = arith.muli %arg0, %c4_i32 : i32
    %1 = arith.addi %0, %arg1 : i32
    %c0_i32 = arith.constant 0 : i32
    %c0_i32_0 = arith.constant 0 : i32
    %c0_i32_1 = arith.constant 0 : i32
    return %1, %c0_i32, %c0_i32_0 : i32, i32, i32
  }
  func.func @transform_1(%arg0: i32, %arg1: i32) -> (i32, i32) {
    %c0_i32 = arith.constant 0 : i32
    %c0_i32_0 = arith.constant 0 : i32
    %c0_i32_1 = arith.constant 0 : i32
    return %c0_i32, %c0_i32_0 : i32, i32
  }
  func.func @transform_2(%arg0: i32, %arg1: i32) -> (i32, i32, i32) {
    %c0_i32 = arith.constant 0 : i32
    %c0_i32_0 = arith.constant 0 : i32
    return %arg0, %c0_i32, %arg1 : i32, i32, i32
  }
}

</mosaic_0001>

<bundles_post_ra>
// kernel: down_conv_forward.1
= control target key start
LH: loop header
LB: loop body
LE: loop exit
PB: predicated region body
PF: predicated region fallthrough
CT: control target
= control target key end

     0   :  { %s529_s9 = smov 0   ;;  %s531_s10 = smov 0   ;;  %s602_s0 = inlined_call_operand.vmem [shape: f32[8,16,256], index: 0, kind: input, shape index: {}]   ;;  %s603_s1 = inlined_call_operand.vmem [shape: f32[32,16], index: 1, kind: input, shape index: {}]   ;;  %s604_s2 = inlined_call_operand.vmem [shape: f32[2,8,512], index: 2, kind: output, shape index: {}]  }
   0x1   :  { %s533_s11 = smov 0   ;;  %s535_s12 = smov 0  }
   0x2   :  { %s537_s13 = smov 0  }
   0x3 LB: > { %s21_s14 = sadd.s32 1, %s500_s11  ;;  %s24_s15 = sadd.s32 1, %s504_s12  ;;  %s508_s13 = sphi %s537_s13, %s12_s13   ;;  %s504_s12 = sphi %s535_s12, %s608_s12   ;;  %s500_s11 = sphi %s533_s11, %s607_s11   ;;  %s496_s10 = sphi %s531_s10, %s606_s10   ;;  %s492_s9 = sphi %s529_s9, %s605_s9  }
   0x4   : > { %p22_p0 = scmp.ge.s32.totalorder %s21_s14, 4  ;;  %p407_p1 = scmp.ge.s32.totalorder %s508_s13, 1 }
   0x5   : > { %p134_p2 = scmp.lt.s32.totalorder %s508_s13, 9 }
   0x6   : > { %s610_s14 = smov (%p22_p0, %s21_s14), 0  ;;  %s612_s15 = smov (!%p22_p0, %s24_s15), %s504_s12 }
   0x7   : > { %p135_p3 = pnand %p407_p1, %p134_p2  ;;  %p26_p4 = scmp.ge.s32.totalorder %s612_s15, 2 }
   0x8   : > { %s408_s16 = sshll.u32 (!%p135_p3), %s496_s10, 2  ;;  %v510_v0 = vmov (!%p135_p3), 0.0   ;;  %v182_v7 = vld [vmem:[%s603_s1] sm:$0xff] (!%p135_p3)  ;;  %vm186_vm0 = vcmask (!%p135_p3), 130048   ;;  %v184_v8 = vld [vmem:[%s603_s1 + $0x10] sm:$0xff] (!%p135_p3)  ;;  %v183_v9 = vld [vmem:[%s603_s1 + $0x8] sm:$0xff] (!%p135_p3) }
   0x9   : > { %s614_s15 = smov (%p26_p4, %s612_s15), 0  ;;  %138 = sbr.rel (%p135_p3) target bundleno = 372 (0x174), region = 28 }
   0xa   : > { %s162_s17 = sadd.s32 (!%p135_p3), %s492_s9, %s408_s16  ;;  %263 = vmatprep.mubr.f32.mxu0 (!%p135_p3), %v510_v0  ;;  %274 = vmatprep.mubr.f32.mxu1 (!%p135_p3), %v510_v0  ;;  %v185_v10 = vld [vmem:[%s603_s1 + $0x18] sm:$0xff] (!%p135_p3)  ;;  %s511_s30 = smov (!%p135_p3), 119   ;;  %vm293_vm1 = vcmask (!%p135_p3), 1039360   ;;  %vm303_vm2 = vcmask (!%p135_p3), 973824   ;;  %vm313_vm3 = vcmask (!%p135_p3), 965632  }
   0xb   : > { %p163_p5 = scmp.lt.s32.totalorder (!%p135_p3), %s162_s17, 7  ;;  %s512_s3 = smov (!%p135_p3), 127  }
   0xc   : > { %s513_s4 = smov (!%p135_p3), 118   ;;  %p170_p6 = scmp.lt.s32.totalorder (!%p135_p3), %s496_s10, 1 }
   0xd   : > { %p172_p7 = scmp.lt.s32.totalorder (!%p135_p3), %s492_s9, 3 }
  0x10   : > { %s616_s17 = smov (!%p163_p5, %s162_s17), 7  ;;  %s618_s10 = smov (!%p170_p6, %s496_s10), 1 }
  0x11   : > { %s419_s18 = sshll.u32 %s616_s17, 5  ;;  %s620_s9 = smov (!%p172_p7, %s492_s9), 3 }
  0x12   : > { %s167_s21 = scalar_lea.vmem %s602_s0, %s419_s18  ;;  %s411_s5 = sshll.u32 %s618_s10, 2 }
  0x13   : > { %v179_v1 = vld [vmem:[%s167_s21 + $0x8] sm:$0xff]  ;;  %v181_v2 = vld [vmem:[%s167_s21 + $0x18] sm:$0xff]  ;;  %v178_v3 = vld [vmem:[%s167_s21] sm:$0xff]  ;;  %s175_s6 = sadd.s32 %s411_s5, %s620_s9 }
  0x14   : > { %v420_v4 = vpack.c.bf16 %v181_v2, %v179_v1  ;;  %v180_v5 = vld [vmem:[%s167_s21 + $0x10] sm:$0xff]  ;;  %s412_s7 = sshll.u32 %s175_s6, 3 }
  0x15   : > { %v422_v6 = vpack.c.bf16 %v180_v5, %v178_v3  ;;  %s177_s17 = scalar_lea.vmem %s604_s2, %s412_s7 }
  0x16   : > { %421 = vmatprep.subr.bf16.mxu0 %v420_v4  ;;  %424 = vmatprep.subr.bf16.mxu1 %v420_v4 }
  0x17   : > { %423 = vmatpush1.bf16.msra.mxu0 %v422_v6  ;;  %425 = vmatpush1.bf16.msra.mxu1 %v422_v6 }
  0x1a   : > { %413 = vmatmul.mubr.msk.f32.vlgmr.msra.gmra.mrb[0].mxu0 %vm186_vm0, %v182_v7  ;;  %415 = vmatmul.mubr.msk.f32.vlgmr.msra.gmra.mrb[0].mxu1 %vm186_vm0, %v184_v8 }
  0x1b   : > { %268 = vmatprep.mubr.f32.mxu0 %v510_v0  ;;  %280 = vmatprep.mubr.f32.mxu1 %v510_v0 }
  0x1e   : > { %414 = vmatmul.mubr.msk.f32.gmra.mrb[2].mxu0 %vm186_vm0, %v183_v9  ;;  %416 = vmatmul.mubr.msk.f32.gmra.mrb[2].mxu1 %vm186_vm0, %v185_v10 }
  0xed   : > { %v265_v11 = vpop.f32.mrb[0].mxu0  ;;  %v276_v12 = vpop.f32.mrb[0].mxu1 }
  0xee   : > { %299 = vrot.lane.b32.xlu1 %v276_v12, %s511_s30  ;;  %v267_v13 = vpop.f32.mrb[1].mxu0  ;;  %v278_v14 = vpop.f32.mrb[1].mxu1 }
  0xf1   : > { %v270_v15 = vpop.f32.mrb[2].mxu0  ;;  %v282_v16 = vpop.f32.mrb[2].mxu1 }
  0xf2   : > { %301 = vrot.lane.b32.xlu1 %v278_v14, %s511_s30  ;;  %289 = vrot.lane.b32.xlu0 %v270_v15, %s512_s3  ;;  %v272_v17 = vpop.f32.mrb[3].mxu0  ;;  %v284_v18 = vpop.f32.mrb[3].mxu1 }
  0xf6   : > { %291 = vrot.lane.b32.xlu0 %v272_v17, %s512_s3  ;;  %311 = vrot.lane.b32.xlu1 %v284_v18, %s513_s4 }
  0xfa   : > { %309 = vrot.lane.b32.xlu0 %v282_v16, %s513_s4 }
 0x160   : > { %v300_v19 = vpop.permute.xlu1 %299 }
 0x164   : > { %v290_v20 = vpop.permute.xlu0 %289  ;;  %v302_v21 = vpop.permute.xlu1 %301 }
 0x165   : > { %v304_v26 = vsel %vm303_vm2, %v300_v19, %v302_v21 }
 0x168   : > { %v292_v22 = vpop.permute.xlu0 %291  ;;  %v312_v25 = vpop.permute.xlu1 %311 }
 0x169   : > { %v294_v23 = vsel %vm293_vm1, %v290_v20, %v292_v22 }
 0x16a   : > { %v296_v24 = vadd.f32 %v294_v23, %v265_v11 }
 0x16c   : > { %v306_v27 = vadd.f32 %v304_v26, %v296_v24  ;;  %v310_v28 = vpop.permute.xlu0 %309 }
 0x16d   : > { %v314_v29 = vsel %vm313_vm3, %v310_v28, %v312_v25 }
 0x16e   : > { %v316_v30 = vadd.f32 %v314_v29, %v306_v27 }
 0x170   : > { %vm317_vm4 = vcmp.gt.f32.partialorder %v316_v30, 0.0  ;;  %v318_v31 = vmul.f32 0.01, %v316_v30 }
 0x172   : > { %v319_v32 = vsel %vm317_vm4, %v316_v30, %v318_v31 }
 0x173   : > { %320 = vst [vmem:[%s177_s17] sm:$0xff] %v319_v32 }
 0x174 PF: > { %s12_s13 = sadd.s32 1, %s508_s13   ;;  %s605_s9 = smov %s500_s11 }
 0x175   : > { %p9_p8 = scmp.ge.s32.totalorder %s12_s13, 10   ;;  %s606_s10 = smov %s504_s12 }
 0x176   : > { %s607_s11 = smov %s610_s14  ;;  %s608_s12 = smov %s614_s15 }
 0x177   :  { %11 = sbr.rel (!%p9_p8) target bundleno = 3 (0x3), region = 58 }

</bundles_post_ra>
